<compile_context>
chip_gen: v7x
topology: tpu7x:2x2x1
jax: 0.10.0
libtpu: 0.0.40
codegen_flags: <defaults>
</compile_context>

<pallas_src>
import functools

import jax
import jax.numpy as jnp
from jax import lax
from jax.experimental import pallas as pl
from jax.experimental.pallas import tpu as pltpu

# Safe scoped-VMEM budget on every generation (v5e/v6e: 128 MiB physical,
# v7x: 64 MiB physical / 32 MiB default scoped). Our tiles need a few MiB.
_VMEM_LIMIT = 32 * 1024 * 1024


def _pick_tile(dim, pref, unit):
    """Largest power-of-two-stepped tile <= pref that evenly divides `dim`,
    never below `unit`. Falls back to the full extent (always legal; bounded
    VMEM cost for the shapes this module sees)."""
    if dim <= pref:
        return dim
    t = pref
    while t >= unit:
        if dim % t == 0:
            return t
        t //= 2
    return dim


def _heads_per_block(heads, dim_head):
    """Smallest head-packing factor hp with heads % hp == 0 and
    (hp * dim_head) % 128 == 0 (lane-dense blocks). None if impossible."""
    hp = 1
    while (hp * dim_head) % 128 != 0:
        hp *= 2
        if hp > heads or heads % hp != 0:
            return None
    return hp


# ---------------------------------------------------------------------------
# Kernel 1: tiled linear (matmul [+ bias]) -- used for to_qkv and to_out
# ---------------------------------------------------------------------------
def _matmul_kernel(x_ref, w_ref, o_ref, acc_ref):
    @pl.when(pl.program_id(2) == 0)
    def _init():
        acc_ref[...] = jnp.zeros_like(acc_ref)

    acc_ref[...] += jnp.dot(x_ref[...], w_ref[...],
                            preferred_element_type=jnp.float32)

    @pl.when(pl.program_id(2) == pl.num_programs(2) - 1)
    def _done():
        o_ref[...] = acc_ref[...].astype(o_ref.dtype)


def _matmul_bias_kernel(x_ref, w_ref, b_ref, o_ref, acc_ref):
    @pl.when(pl.program_id(2) == 0)
    def _init():
        acc_ref[...] = jnp.zeros_like(acc_ref)

    acc_ref[...] += jnp.dot(x_ref[...], w_ref[...],
                            preferred_element_type=jnp.float32)

    @pl.when(pl.program_id(2) == pl.num_programs(2) - 1)
    def _done():
        o_ref[...] = (acc_ref[...] + b_ref[...]).astype(o_ref.dtype)


# Degenerate K (single reduction step): no k grid axis, no accumulator scratch.
def _matmul_1k_kernel(x_ref, w_ref, o_ref):
    o_ref[...] = jnp.dot(x_ref[...], w_ref[...],
                         preferred_element_type=jnp.float32).astype(o_ref.dtype)


def _matmul_1k_bias_kernel(x_ref, w_ref, b_ref, o_ref):
    o_ref[...] = (jnp.dot(x_ref[...], w_ref[...],
                          preferred_element_type=jnp.float32)
                  + b_ref[...]).astype(o_ref.dtype)


def pallas_linear(x, w, b=None, *, out_dtype=jnp.float32, tm=512, tn=512, tk=256):
    """x: (M, K) @ w: (K, N) [+ b: (N,)]. bf16 MXU inputs, f32 accumulation."""
    M, K = x.shape
    K2, N = w.shape
    assert K == K2
    x = x.astype(jnp.bfloat16)
    w = w.astype(jnp.bfloat16)

    tm = _pick_tile(M, tm, 128)   # sublane dim of x / out blocks
    tk = _pick_tile(K, tk, 128)   # lane dim of x block, sublane of w block
    tn = _pick_tile(N, tn, 128)   # lane dim of w / out blocks
    nk = K // tk

    cost = pl.CostEstimate(
        flops=2 * M * N * K,
        transcendentals=0,
        bytes_accessed=(M * K * 2 * (N // tn) + K * N * 2 * (M // tm)
                        + M * N * jnp.dtype(out_dtype).itemsize
                        + (N * 4 if b is not None else 0)))

    if nk == 1:
        params = pltpu.CompilerParams(
            dimension_semantics=("parallel", "parallel"),
            vmem_limit_bytes=_VMEM_LIMIT)
        x_spec = pl.BlockSpec((tm, K), lambda i, j: (i, 0))
        w_spec = pl.BlockSpec((K, tn), lambda i, j: (0, j))
        o_spec = pl.BlockSpec((tm, tn), lambda i, j: (i, j))
        grid = (M // tm, N // tn)
        if b is None:
            return pl.pallas_call(
                _matmul_1k_kernel,
                out_shape=jax.ShapeDtypeStruct((M, N), out_dtype),
                grid=grid, in_specs=[x_spec, w_spec], out_specs=o_spec,
                compiler_params=params, cost_estimate=cost,
            )(x, w)
        b2 = b.astype(jnp.float32).reshape(1, N)
        b_spec = pl.BlockSpec((1, tn), lambda i, j: (0, j))
        return pl.pallas_call(
            _matmul_1k_bias_kernel,
            out_shape=jax.ShapeDtypeStruct((M, N), out_dtype),
            grid=grid, in_specs=[x_spec, w_spec, b_spec], out_specs=o_spec,
            compiler_params=params, cost_estimate=cost,
        )(x, w, b2)

    params = pltpu.CompilerParams(
        dimension_semantics=("parallel", "parallel", "arbitrary"),
        vmem_limit_bytes=_VMEM_LIMIT)
    grid = (M // tm, N // tn, nk)
    if b is None:
        return pl.pallas_call(
            _matmul_kernel,
            out_shape=jax.ShapeDtypeStruct((M, N), out_dtype),
            grid=grid,
            in_specs=[pl.BlockSpec((tm, tk), lambda i, j, k: (i, k)),
                      pl.BlockSpec((tk, tn), lambda i, j, k: (k, j))],
            out_specs=pl.BlockSpec((tm, tn), lambda i, j, k: (i, j)),
            scratch_shapes=[pltpu.VMEM((tm, tn), jnp.float32)],
            compiler_params=params, cost_estimate=cost,
        )(x, w)

    b2 = b.astype(jnp.float32).reshape(1, N)
    return pl.pallas_call(
        _matmul_bias_kernel,
        out_shape=jax.ShapeDtypeStruct((M, N), out_dtype),
        grid=grid,
        in_specs=[pl.BlockSpec((tm, tk), lambda i, j, k: (i, k)),
                  pl.BlockSpec((tk, tn), lambda i, j, k: (k, j)),
                  pl.BlockSpec((1, tn), lambda i, j, k: (0, j))],
        out_specs=pl.BlockSpec((tm, tn), lambda i, j, k: (i, j)),
        scratch_shapes=[pltpu.VMEM((tm, tn), jnp.float32)],
        compiler_params=params, cost_estimate=cost,
    )(x, w, b2)


# ---------------------------------------------------------------------------
# Kernel 2: flash attention over head-pair-packed qkv, grid = (B, H/hp, nq, nk)
#
# Reads Q/K/V directly from the (B, Npad, 3*inner) qkv projection output and
# writes the attention output directly in 'b n (h d)' layout -> no transposes,
# and every block is 128-lane dense.
# ---------------------------------------------------------------------------
def _flash_kernel(q_ref, k_ref, v_ref, o_ref, m_ref, l_ref, acc_ref, *,
                  scale, dim_head, heads_per_block, block_k, kv_len):
    kv = pl.program_id(3)

    @pl.when(kv == 0)
    def _init():
        m_ref[...] = jnp.full_like(m_ref, -jnp.inf)
        l_ref[...] = jnp.zeros_like(l_ref)
        acc_ref[...] = jnp.zeros_like(acc_ref)

    # Scale q once per tile (tq * hp*dh mults) instead of the (tq, tk) scores.
    q = q_ref[0] * scale       # (tq, hp*dh) bf16
    k = k_ref[0]               # (tk, hp*dh) bf16
    v = v_ref[0]               # (tk, hp*dh) bf16

    key_valid = None
    if kv_len is not None:     # compile-time gate: only emitted when N is padded
        key_idx = kv * block_k + lax.broadcasted_iota(jnp.int32, (1, block_k), 1)
        key_valid = key_idx < kv_len                      # (1, tk) bool

    for h in range(heads_per_block):                      # static unroll (hp small)
        lo, hi = h * dim_head, (h + 1) * dim_head
        # Contract last dims of both operands: K fed to the MXU untransposed.
        s = lax.dot_general(q[:, lo:hi], k[:, lo:hi], (((1,), (1,)), ((), ())),
                            preferred_element_type=jnp.float32)   # (tq, tk) f32
        if key_valid is not None:
            s = jnp.where(key_valid, s, -jnp.inf)

        m_prev = m_ref[h]
        m_new = jnp.maximum(m_prev, jnp.max(s, axis=-1, keepdims=True))
        alpha = jnp.exp(m_prev - m_new)
        p = jnp.exp(s - m_new)
        l_ref[h] = alpha * l_ref[h] + jnp.sum(p, axis=-1, keepdims=True)
        acc_ref[h] = alpha * acc_ref[h] + jnp.dot(
            p.astype(v.dtype), v[:, lo:hi], preferred_element_type=jnp.float32)
        m_ref[h] = m_new

    @pl.when(kv == pl.num_programs(3) - 1)
    def _finish():
        o_ref[0] = jnp.concatenate(
            [(acc_ref[h] * pl.reciprocal(l_ref[h], approx=True)).astype(o_ref.dtype)
             for h in range(heads_per_block)], axis=-1)


def pallas_flash_attn(qkv, *, heads, dim_head, heads_per_block, scale,
                      seq_tile, kv_len=None):
    """qkv: (B, Npad, 3*inner) bf16 laid out [Q | K | V], heads contiguous.
    Returns attention output (B, Npad, inner) bf16 in 'b n (h d)' layout."""
    B, Npad, F = qkv.shape
    inner = heads * dim_head
    assert F == 3 * inner
    hp = heads_per_block
    w = hp * dim_head            # lane width of one head pack (multiple of 128)
    H2 = heads // hp
    t = seq_tile
    nq = Npad // t
    nk = Npad // t
    grid = (B, H2, nq, nk)

    # Column-block indices into the fused [Q | K | V] feature axis.
    q_spec = pl.BlockSpec((1, t, w), lambda b, h, qi, ki: (b, qi, h))
    k_spec = pl.BlockSpec((1, t, w), lambda b, h, qi, ki: (b, ki, h + H2))
    v_spec = pl.BlockSpec((1, t, w), lambda b, h, qi, ki: (b, ki, h + 2 * H2))
    o_spec = pl.BlockSpec((1, t, w), lambda b, h, qi, ki: (b, qi, h))

    cost = pl.CostEstimate(
        flops=4 * B * heads * Npad * Npad * dim_head,
        transcendentals=B * heads * Npad * Npad,
        # Q + O once, K/V re-read once per q tile.
        bytes_accessed=B * Npad * inner * 2 * (2 + 2 * nq))

    kernel = functools.partial(
        _flash_kernel, scale=scale, dim_head=dim_head, heads_per_block=hp,
        block_k=t, kv_len=kv_len)

    # NOTE(v5e): for long sequences, tk-deep K/V buffering (pipeline_mode=
    # pl.Buffered(3)) and seq_tile=128 are worth sweeping; defaults target v6e/v7x.
    return pl.pallas_call(
        kernel,
        out_shape=jax.ShapeDtypeStruct((B, Npad, inner), jnp.bfloat16),
        grid=grid,
        in_specs=[q_spec, k_spec, v_spec],
        out_specs=o_spec,
        scratch_shapes=[pltpu.VMEM((hp, t, 1), jnp.float32),         # running max m
                        pltpu.VMEM((hp, t, 1), jnp.float32),         # running sum l
                        pltpu.VMEM((hp, t, dim_head), jnp.float32)], # output accumulator
        compiler_params=pltpu.CompilerParams(
            dimension_semantics=("parallel", "parallel", "parallel", "arbitrary"),
            vmem_limit_bytes=_VMEM_LIMIT),
        cost_estimate=cost,
    )(qkv, qkv, qkv)


# ---------------------------------------------------------------------------
# Parameter prep (one-time, outside the hot path) + full module forward
# ---------------------------------------------------------------------------
def prepare_params(torch_params):
    """Convert torch-layout f32 params once: weights pre-transposed to (in, out)
    and stored in bf16 in HBM (no per-call .T / cast)."""
    return {
        "w_qkv": jnp.asarray(torch_params["w_qkv"]).T.astype(jnp.bfloat16),  # (D, 3*inner)
        "w_out": jnp.asarray(torch_params["w_out"]).T.astype(jnp.bfloat16),  # (inner, D)
        "b_out": jnp.asarray(torch_params["b_out"]).astype(jnp.float32),     # (D,)
    }


def attention_forward(x, params, *, heads, dim_head, seq_tile=256):
    B, N, D = x.shape
    inner = heads * dim_head
    scale = dim_head ** (-0.5)

    hp = _heads_per_block(heads, dim_head)
    # TODO(synk): add a lane-sparse fallback attention path for configs where no
    # head-packing factor exists (e.g. heads == 1 with dim_head == 64).
    assert hp is not None, "need heads % hp == 0 with hp*dim_head % 128 == 0"

    # Pad the sequence so it tiles cleanly; padded keys are masked in-kernel,
    # padded query rows are sliced off at the end.
    t = seq_tile if N >= seq_tile else -(-N // 8) * 8
    n_pad = (-N) % t
    Npad = N + n_pad
    xp = x if n_pad == 0 else jnp.pad(x, ((0, 0), (0, n_pad), (0, 0)))

    # to_qkv (bias-free): (B*Npad, D) @ (D, 3*inner); bf16 output feeds the MXU next.
    qkv = pallas_linear(xp.reshape(B * Npad, D), params["w_qkv"],
                        out_dtype=jnp.bfloat16)                 # (B*Npad, 3*inner)
    qkv = qkv.reshape(B, Npad, 3 * inner)                       # free reshape

    # Flash attention reads Q/K/V straight out of `qkv` (head-pair packed,
    # 128-lane blocks) and writes directly in 'b n (h d)' layout.
    out = pallas_flash_attn(qkv, heads=heads, dim_head=dim_head,
                            heads_per_block=hp, scale=scale, seq_tile=t,
                            kv_len=N if n_pad else None)        # (B, Npad, inner) bf16

    # to_out: Linear(inner, D) with bias (dropout=0.0 -> identity).
    y = pallas_linear(out.reshape(B * Npad, inner), params["w_out"],
                      params["b_out"], out_dtype=jnp.float32)
    y = y.reshape(B, Npad, D)
    return y if n_pad == 0 else y[:, :N, :]


# ---------------------------------------------------------------------------
# Pure-JAX f32 reference (matches the PyTorch forward) for validation
# ---------------------------------------------------------------------------
def attention_reference(x, torch_params, *, heads, dim_head):
    B, N, D = x.shape
    inner = heads * dim_head
    scale = dim_head ** (-0.5)
    qkv = x @ torch_params["w_qkv"].T
    q, k, v = jnp.split(qkv, 3, axis=-1)
    reshape = lambda t: t.reshape(B, N, heads, dim_head).transpose(0, 2, 1, 3)
    q, k, v = map(reshape, (q, k, v))
    dots = jnp.einsum("bhnd,bhmd->bhnm", q, k) * scale
    attn = jax.nn.softmax(dots, axis=-1)
    out = jnp.einsum("bhnm,bhmd->bhnd", attn, v)
    out = out.transpose(0, 2, 1, 3).reshape(B, N, inner)
    return out @ torch_params["w_out"].T + torch_params["b_out"]


if __name__ == "__main__":
    # Module config (PyTorch defaults): heads=8, dim_head=64, dropout=0.0
    heads, dim_head = 8, 64
    dim = 32                      # model dim
    inner = heads * dim_head      # 512
    B, N = 2, 8                   # small batch / sequence

    key = jax.random.PRNGKey(0)
    kx, kq, kw, kb = jax.random.split(key, 4)

    x = jax.random.normal(kx, (B, N, dim), dtype=jnp.float32)
    torch_params = {
        # torch Linear layout: (out_features, in_features)
        "w_qkv": jax.random.normal(kq, (3 * inner, dim), dtype=jnp.float32) * 0.05,
        "w_out": jax.random.normal(kw, (dim, inner), dtype=jnp.float32) * 0.05,
        "b_out": jax.random.normal(kb, (dim,), dtype=jnp.float32) * 0.05,
    }
    params = prepare_params(torch_params)

    fwd = jax.jit(functools.partial(attention_forward, heads=heads, dim_head=dim_head))

    # Check 1: aligned sequence length (no padding / masking path).
    y = jax.block_until_ready(fwd(x, params))
    y_ref = attention_reference(x, torch_params, heads=heads, dim_head=dim_head)
    assert y.shape == (B, N, dim)
    assert jnp.allclose(y, y_ref, atol=3e-2, rtol=3e-2), "mismatch vs f32 reference"

    # Check 2: unaligned sequence length (exercises pad + in-kernel key masking).
    N2 = 13
    x2 = jax.random.normal(jax.random.PRNGKey(1), (B, N2, dim), dtype=jnp.float32)
    y2 = jax.block_until_ready(fwd(x2, params))
    y2_ref = attention_reference(x2, torch_params, heads=heads, dim_head=dim_head)
    assert y2.shape == (B, N2, dim)
    assert jnp.allclose(y2, y2_ref, atol=3e-2, rtol=3e-2), "masked-path mismatch"

    print("KERNEL_OK")
</pallas_src>

<mosaic_0001>
module attributes {stable_mosaic.version = 11 : i64} {
  func.func @_matmul_1k_kernel(%arg0: i32, %arg1: i32, %arg2: memref<16x32xbf16, #tpu.memory_space<vmem>>, %arg3: memref<32x512xbf16, #tpu.memory_space<vmem>>, %arg4: memref<16x512xbf16, #tpu.memory_space<vmem>>) attributes {dimension_semantics = [#tpu.dimension_semantics<parallel>, #tpu.dimension_semantics<parallel>], iteration_bounds = array<i64: 1, 3>, scalar_prefetch = 0 : i64, scratch_operands = 0 : i64, tpu.core_type = #tpu.core_type<tc>, window_params = [{transform_indices = @transform_0, window_bounds = array<i64: 16, 32>}, {transform_indices = @transform_1, window_bounds = array<i64: 32, 512>}, {transform_indices = @transform_2, window_bounds = array<i64: 16, 512>}]} {
    %c0 = arith.constant 0 : index
    %c0_0 = arith.constant 0 : index
    %0 = vector.load %arg2[%c0, %c0_0] : memref<16x32xbf16, #tpu.memory_space<vmem>>, vector<16x32xbf16>
    %c0_1 = arith.constant 0 : index
    %c0_2 = arith.constant 0 : index
    %1 = vector.load %arg3[%c0_1, %c0_2] : memref<32x512xbf16, #tpu.memory_space<vmem>>, vector<32x512xbf16>
    %cst = arith.constant dense<0.000000e+00> : vector<16x512xf32>
    %2 = tpu.matmul %0, %1, %cst {dimension_numbers = #tpu.dot_dimension_numbers<[1], [0], [0], [1], [0, 0, 1, 1], [], []>} : vector<16x32xbf16>, vector<32x512xbf16>, vector<16x512xf32> -> vector<16x512xf32>
    %3 = arith.truncf %2 : vector<16x512xf32> to vector<16x512xbf16>
    %c0_3 = arith.constant 0 : index
    %c0_4 = arith.constant 0 : index
    %4 = vector.load %arg4[%c0_3, %c0_4] : memref<16x512xbf16, #tpu.memory_space<vmem>>, vector<16x512xbf16>
    tpu.vector_store %arg4[%c0_3, %c0_4], %3 {strides = array<i32>} : memref<16x512xbf16, #tpu.memory_space<vmem>>, vector<16x512xbf16>,
    return
  }
  func.func @transform_0(%arg0: i32, %arg1: i32) -> (i32, i32) {
    %c0_i32 = arith.constant 0 : i32
    %c0_i32_0 = arith.constant 0 : i32
    return %arg0, %c0_i32 : i32, i32
  }
  func.func @transform_1(%arg0: i32, %arg1: i32) -> (i32, i32) {
    %c0_i32 = arith.constant 0 : i32
    %c0_i32_0 = arith.constant 0 : i32
    return %c0_i32, %arg1 : i32, i32
  }
  func.func @transform_2(%arg0: i32, %arg1: i32) -> (i32, i32) {
    %c0_i32 = arith.constant 0 : i32
    return %arg0, %arg1 : i32, i32
  }
}

module attributes {stable_mosaic.version = 11 : i64} {
  func.func @_flash_kernel(%arg0: i32, %arg1: i32, %arg2: i32, %arg3: i32, %arg4: memref<1x8x128xbf16, #tpu.memory_space<vmem>>, %arg5: memref<1x8x128xbf16, #tpu.memory_space<vmem>>, %arg6: memref<1x8x128xbf16, #tpu.memory_space<vmem>>, %arg7: memref<1x8x128xbf16, #tpu.memory_space<vmem>>, %arg8: memref<2x8x1xf32, #tpu.memory_space<vmem>>, %arg9: memref<2x8x1xf32, #tpu.memory_space<vmem>>, %arg10: memref<2x8x64xf32, #tpu.memory_space<vmem>>) attributes {dimension_semantics = [#tpu.dimension_semantics<parallel>, #tpu.dimension_semantics<parallel>, #tpu.dimension_semantics<parallel>, #tpu.dimension_semantics<arbitrary>], iteration_bounds = array<i64: 2, 4, 1, 1>, scalar_prefetch = 0 : i64, scratch_operands = 3 : i64, tpu.core_type = #tpu.core_type<tc>, window_params = [{transform_indices = @transform_0, window_bounds = array<i64: 1, 8, 128>}, {transform_indices = @transform_1, window_bounds = array<i64: 1, 8, 128>}, {transform_indices = @transform_2, window_bounds = array<i64: 1, 8, 128>}, {transform_indices = @transform_3, window_bounds = array<i64: 1, 8, 128>}]} {
    %c0_i32 = arith.constant 0 : i32
    %0 = arith.cmpi eq, %arg3, %c0_i32 : i32
    %1 = arith.extui %0 : i1 to i32
    %c0_i32_0 = arith.constant 0 : i32
    %2 = arith.cmpi ne, %1, %c0_i32_0 : i32
    scf.if %2 {
      %cst_54 = arith.constant 0xFF800000 : f32
      %86 = vector.broadcast %cst_54 : f32 to vector<2x8x1xf32>
      %c0_55 = arith.constant 0 : index
      %c0_56 = arith.constant 0 : index
      %c0_57 = arith.constant 0 : index
      %87 = vector.load %arg8[%c0_55, %c0_56, %c0_57] : memref<2x8x1xf32, #tpu.memory_space<vmem>>, vector<2x8x1xf32>
      tpu.vector_store %arg8[%c0_55, %c0_56, %c0_57], %86 {strides = array<i32>} : memref<2x8x1xf32, #tpu.memory_space<vmem>>, vector<2x8x1xf32>,
      %cst_58 = arith.constant 0.000000e+00 : f32
      %88 = vector.broadcast %cst_58 : f32 to vector<2x8x1xf32>
      %c0_59 = arith.constant 0 : index
      %c0_60 = arith.constant 0 : index
      %c0_61 = arith.constant 0 : index
      %89 = vector.load %arg9[%c0_59, %c0_60, %c0_61] : memref<2x8x1xf32, #tpu.memory_space<vmem>>, vector<2x8x1xf32>
      tpu.vector_store %arg9[%c0_59, %c0_60, %c0_61], %88 {strides = array<i32>} : memref<2x8x1xf32, #tpu.memory_space<vmem>>, vector<2x8x1xf32>,
      %cst_62 = arith.constant 0.000000e+00 : f32
      %90 = vector.broadcast %cst_62 : f32 to vector<2x8x64xf32>
      %c0_63 = arith.constant 0 : index
      %c0_64 = arith.constant 0 : index
      %c0_65 = arith.constant 0 : index
      %91 = vector.load %arg10[%c0_63, %c0_64, %c0_65] : memref<2x8x64xf32, #tpu.memory_space<vmem>>, vector<2x8x64xf32>
      tpu.vector_store %arg10[%c0_63, %c0_64, %c0_65], %90 {strides = array<i32>} : memref<2x8x64xf32, #tpu.memory_space<vmem>>, vector<2x8x64xf32>,
    } else {
    }
    %c0 = arith.constant 0 : index
    %c0_1 = arith.constant 0 : index
    %c0_2 = arith.constant 0 : index
    %3 = vector.load %arg4[%c0, %c0_1, %c0_2] : memref<1x8x128xbf16, #tpu.memory_space<vmem>>, vector<1x8x128xbf16>
    %4 = vector.shape_cast %3 : vector<1x8x128xbf16> to vector<8x128xbf16>
    %cst = arith.constant 1.250000e-01 : bf16
    %5 = vector.broadcast %cst : bf16 to vector<8x128xbf16>
    %6 = arith.mulf %4, %5 : vector<8x128xbf16>
    %c0_3 = arith.constant 0 : index
    %c0_4 = arith.constant 0 : index
    %c0_5 = arith.constant 0 : index
    %7 = vector.load %arg5[%c0_3, %c0_4, %c0_5] : memref<1x8x128xbf16, #tpu.memory_space<vmem>>, vector<1x8x128xbf16>
    %8 = vector.shape_cast %7 : vector<1x8x128xbf16> to vector<8x128xbf16>
    %c0_6 = arith.constant 0 : index
    %c0_7 = arith.constant 0 : index
    %c0_8 = arith.constant 0 : index
    %9 = vector.load %arg6[%c0_6, %c0_7, %c0_8] : memref<1x8x128xbf16, #tpu.memory_space<vmem>>, vector<1x8x128xbf16>
    %10 = vector.shape_cast %9 : vector<1x8x128xbf16> to vector<8x128xbf16>
    %11 = vector.extract_strided_slice %6 {offsets = [0, 0], sizes = [8, 64], strides = [1, 1]} : vector<8x128xbf16> to vector<8x64xbf16>
    %12 = vector.extract_strided_slice %8 {offsets = [0, 0], sizes = [8, 64], strides = [1, 1]} : vector<8x128xbf16> to vector<8x64xbf16>
    %cst_9 = arith.constant dense<0.000000e+00> : vector<8x8xf32>
    %13 = tpu.matmul %11, %12, %cst_9 {dimension_numbers = #tpu.dot_dimension_numbers<[1], [1], [0], [0], [0, 0, 1, 0], [], []>} : vector<8x64xbf16>, vector<8x64xbf16>, vector<8x8xf32> -> vector<8x8xf32>
    %c0_10 = arith.constant 0 : index
    %c0_11 = arith.constant 0 : index
    %c0_12 = arith.constant 0 : index
    %14 = vector.load %arg8[%c0_10, %c0_11, %c0_12] : memref<2x8x1xf32, #tpu.memory_space<vmem>>, vector<1x8x1xf32>
    %15 = vector.shape_cast %14 : vector<1x8x1xf32> to vector<8x1xf32>
    %cst_13 = arith.constant dense<0xFF800000> : vector<8xf32>
    %16 = vector.multi_reduction <maximumf>, %13, %cst_13 [1] : vector<8x8xf32> to vector<8xf32>
    %17 = vector.shape_cast %16 : vector<8xf32> to vector<8x1xf32>
    %18 = arith.maximumf %15, %17 : vector<8x1xf32>
    %19 = arith.subf %15, %18 : vector<8x1xf32>
    %20 = math.exp %19 : vector<8x1xf32>
    %21 = vector.broadcast %18 : vector<8x1xf32> to vector<8x8xf32>
    %22 = arith.subf %13, %21 : vector<8x8xf32>
    %23 = math.exp %22 : vector<8x8xf32>
    %c0_14 = arith.constant 0 : index
    %c0_15 = arith.constant 0 : index
    %c0_16 = arith.constant 0 : index
    %24 = vector.load %arg9[%c0_14, %c0_15, %c0_16] : memref<2x8x1xf32, #tpu.memory_space<vmem>>, vector<1x8x1xf32>
    %25 = vector.shape_cast %24 : vector<1x8x1xf32> to vector<8x1xf32>
    %26 = arith.mulf %20, %25 : vector<8x1xf32>
    %cst_17 = arith.constant dense<0.000000e+00> : vector<8xf32>
    %27 = vector.multi_reduction <add>, %23, %cst_17 [1] : vector<8x8xf32> to vector<8xf32>
    %28 = vector.shape_cast %27 : vector<8xf32> to vector<8x1xf32>
    %29 = arith.addf %26, %28 : vector<8x1xf32>
    %c0_18 = arith.constant 0 : index
    %c0_19 = arith.constant 0 : index
    %c0_20 = arith.constant 0 : index
    %30 = vector.load %arg9[%c0_18, %c0_19, %c0_20] : memref<2x8x1xf32, #tpu.memory_space<vmem>>, vector<1x8x1xf32>
    %31 = vector.shape_cast %30 : vector<1x8x1xf32> to vector<8x1xf32>
    %32 = vector.shape_cast %29 : vector<8x1xf32> to vector<1x8x1xf32>
    tpu.vector_store %arg9[%c0_18, %c0_19, %c0_20], %32 {strides = array<i32>} : memref<2x8x1xf32, #tpu.memory_space<vmem>>, vector<1x8x1xf32>,
    %c0_21 = arith.constant 0 : index
    %c0_22 = arith.constant 0 : index
    %c0_23 = arith.constant 0 : index
    %33 = vector.load %arg10[%c0_21, %c0_22, %c0_23] : memref<2x8x64xf32, #tpu.memory_space<vmem>>, vector<1x8x64xf32>
    %34 = vector.shape_cast %33 : vector<1x8x64xf32> to vector<8x64xf32>
    %35 = vector.broadcast %20 : vector<8x1xf32> to vector<8x64xf32>
    %36 = arith.mulf %35, %34 : vector<8x64xf32>
    %37 = arith.truncf %23 : vector<8x8xf32> to vector<8x8xbf16>
    %38 = vector.extract_strided_slice %10 {offsets = [0, 0], sizes = [8, 64], strides = [1, 1]} : vector<8x128xbf16> to vector<8x64xbf16>
    %cst_24 = arith.constant dense<0.000000e+00> : vector<8x64xf32>
    %39 = tpu.matmul %37, %38, %cst_24 {dimension_numbers = #tpu.dot_dimension_numbers<[1], [0], [0], [1], [0, 0, 1, 1], [], []>} : vector<8x8xbf16>, vector<8x64xbf16>, vector<8x64xf32> -> vector<8x64xf32>
    %40 = arith.addf %36, %39 : vector<8x64xf32>
    %c0_25 = arith.constant 0 : index
    %c0_26 = arith.constant 0 : index
    %c0_27 = arith.constant 0 : index
    %41 = vector.load %arg10[%c0_25, %c0_26, %c0_27] : memref<2x8x64xf32, #tpu.memory_space<vmem>>, vector<1x8x64xf32>
    %42 = vector.shape_cast %41 : vector<1x8x64xf32> to vector<8x64xf32>
    %43 = vector.shape_cast %40 : vector<8x64xf32> to vector<1x8x64xf32>
    tpu.vector_store %arg10[%c0_25, %c0_26, %c0_27], %43 {strides = array<i32>} : memref<2x8x64xf32, #tpu.memory_space<vmem>>, vector<1x8x64xf32>,
    %c0_28 = arith.constant 0 : index
    %c0_29 = arith.constant 0 : index
    %c0_30 = arith.constant 0 : index
    %44 = vector.load %arg8[%c0_28, %c0_29, %c0_30] : memref<2x8x1xf32, #tpu.memory_space<vmem>>, vector<1x8x1xf32>
    %45 = vector.shape_cast %44 : vector<1x8x1xf32> to vector<8x1xf32>
    %46 = vector.shape_cast %18 : vector<8x1xf32> to vector<1x8x1xf32>
    tpu.vector_store %arg8[%c0_28, %c0_29, %c0_30], %46 {strides = array<i32>} : memref<2x8x1xf32, #tpu.memory_space<vmem>>, vector<1x8x1xf32>,
    %47 = vector.extract_strided_slice %6 {offsets = [0, 64], sizes = [8, 64], strides = [1, 1]} : vector<8x128xbf16> to vector<8x64xbf16>
    %48 = vector.extract_strided_slice %8 {offsets = [0, 64], sizes = [8, 64], strides = [1, 1]} : vector<8x128xbf16> to vector<8x64xbf16>
    %cst_31 = arith.constant dense<0.000000e+00> : vector<8x8xf32>
    %49 = tpu.matmul %47, %48, %cst_31 {dimension_numbers = #tpu.dot_dimension_numbers<[1], [1], [0], [0], [0, 0, 1, 0], [], []>} : vector<8x64xbf16>, vector<8x64xbf16>, vector<8x8xf32> -> vector<8x8xf32>
    %c1 = arith.constant 1 : index
    %c0_32 = arith.constant 0 : index
    %c0_33 = arith.constant 0 : index
    %50 = vector.load %arg8[%c1, %c0_32, %c0_33] : memref<2x8x1xf32, #tpu.memory_space<vmem>>, vector<1x8x1xf32>
    %51 = vector.shape_cast %50 : vector<1x8x1xf32> to vector<8x1xf32>
    %cst_34 = arith.constant dense<0xFF800000> : vector<8xf32>
    %52 = vector.multi_reduction <maximumf>, %49, %cst_34 [1] : vector<8x8xf32> to vector<8xf32>
    %53 = vector.shape_cast %52 : vector<8xf32> to vector<8x1xf32>
    %54 = arith.maximumf %51, %53 : vector<8x1xf32>
    %55 = arith.subf %51, %54 : vector<8x1xf32>
    %56 = math.exp %55 : vector<8x1xf32>
    %57 = vector.broadcast %54 : vector<8x1xf32> to vector<8x8xf32>
    %58 = arith.subf %49, %57 : vector<8x8xf32>
    %59 = math.exp %58 : vector<8x8xf32>
    %c1_35 = arith.constant 1 : index
    %c0_36 = arith.constant 0 : index
    %c0_37 = arith.constant 0 : index
    %60 = vector.load %arg9[%c1_35, %c0_36, %c0_37] : memref<2x8x1xf32, #tpu.memory_space<vmem>>, vector<1x8x1xf32>
    %61 = vector.shape_cast %60 : vector<1x8x1xf32> to vector<8x1xf32>
    %62 = arith.mulf %56, %61 : vector<8x1xf32>
    %cst_38 = arith.constant dense<0.000000e+00> : vector<8xf32>
    %63 = vector.multi_reduction <add>, %59, %cst_38 [1] : vector<8x8xf32> to vector<8xf32>
    %64 = vector.shape_cast %63 : vector<8xf32> to vector<8x1xf32>
    %65 = arith.addf %62, %64 : vector<8x1xf32>
    %c1_39 = arith.constant 1 : index
    %c0_40 = arith.constant 0 : index
    %c0_41 = arith.constant 0 : index
    %66 = vector.load %arg9[%c1_39, %c0_40, %c0_41] : memref<2x8x1xf32, #tpu.memory_space<vmem>>, vector<1x8x1xf32>
    %67 = vector.shape_cast %66 : vector<1x8x1xf32> to vector<8x1xf32>
    %68 = vector.shape_cast %65 : vector<8x1xf32> to vector<1x8x1xf32>
    tpu.vector_store %arg9[%c1_39, %c0_40, %c0_41], %68 {strides = array<i32>} : memref<2x8x1xf32, #tpu.memory_space<vmem>>, vector<1x8x1xf32>,
    %c1_42 = arith.constant 1 : index
    %c0_43 = arith.constant 0 : index
    %c0_44 = arith.constant 0 : index
    %69 = vector.load %arg10[%c1_42, %c0_43, %c0_44] : memref<2x8x64xf32, #tpu.memory_space<vmem>>, vector<1x8x64xf32>
    %70 = vector.shape_cast %69 : vector<1x8x64xf32> to vector<8x64xf32>
    %71 = vector.broadcast %56 : vector<8x1xf32> to vector<8x64xf32>
    %72 = arith.mulf %71, %70 : vector<8x64xf32>
    %73 = arith.truncf %59 : vector<8x8xf32> to vector<8x8xbf16>
    %74 = vector.extract_strided_slice %10 {offsets = [0, 64], sizes = [8, 64], strides = [1, 1]} : vector<8x128xbf16> to vector<8x64xbf16>
    %cst_45 = arith.constant dense<0.000000e+00> : vector<8x64xf32>
    %75 = tpu.matmul %73, %74, %cst_45 {dimension_numbers = #tpu.dot_dimension_numbers<[1], [0], [0], [1], [0, 0, 1, 1], [], []>} : vector<8x8xbf16>, vector<8x64xbf16>, vector<8x64xf32> -> vector<8x64xf32>
    %76 = arith.addf %72, %75 : vector<8x64xf32>
    %c1_46 = arith.constant 1 : index
    %c0_47 = arith.constant 0 : index
    %c0_48 = arith.constant 0 : index
    %77 = vector.load %arg10[%c1_46, %c0_47, %c0_48] : memref<2x8x64xf32, #tpu.memory_space<vmem>>, vector<1x8x64xf32>
    %78 = vector.shape_cast %77 : vector<1x8x64xf32> to vector<8x64xf32>
    %79 = vector.shape_cast %76 : vector<8x64xf32> to vector<1x8x64xf32>
    tpu.vector_store %arg10[%c1_46, %c0_47, %c0_48], %79 {strides = array<i32>} : memref<2x8x64xf32, #tpu.memory_space<vmem>>, vector<1x8x64xf32>,
    %c1_49 = arith.constant 1 : index
    %c0_50 = arith.constant 0 : index
    %c0_51 = arith.constant 0 : index
    %80 = vector.load %arg8[%c1_49, %c0_50, %c0_51] : memref<2x8x1xf32, #tpu.memory_space<vmem>>, vector<1x8x1xf32>
    %81 = vector.shape_cast %80 : vector<1x8x1xf32> to vector<8x1xf32>
    %82 = vector.shape_cast %54 : vector<8x1xf32> to vector<1x8x1xf32>
    tpu.vector_store %arg8[%c1_49, %c0_50, %c0_51], %82 {strides = array<i32>} : memref<2x8x1xf32, #tpu.memory_space<vmem>>, vector<1x8x1xf32>,
    %c0_i32_52 = arith.constant 0 : i32
    %83 = arith.cmpi eq, %arg3, %c0_i32_52 : i32
    %84 = arith.extui %83 : i1 to i32
    %c0_i32_53 = arith.constant 0 : i32
    %85 = arith.cmpi ne, %84, %c0_i32_53 : i32
    scf.if %85 {
      %c0_54 = arith.constant 0 : index
      %c0_55 = arith.constant 0 : index
      %c0_56 = arith.constant 0 : index
      %86 = vector.load %arg10[%c0_54, %c0_55, %c0_56] : memref<2x8x64xf32, #tpu.memory_space<vmem>>, vector<1x8x64xf32>
      %87 = vector.shape_cast %86 : vector<1x8x64xf32> to vector<8x64xf32>
      %c0_57 = arith.constant 0 : index
      %c0_58 = arith.constant 0 : index
      %c0_59 = arith.constant 0 : index
      %88 = vector.load %arg9[%c0_57, %c0_58, %c0_59] : memref<2x8x1xf32, #tpu.memory_space<vmem>>, vector<1x8x1xf32>
      %89 = vector.shape_cast %88 : vector<1x8x1xf32> to vector<8x1xf32>
      %90 = tpu.reciprocal %89 {approx = true} : vector<8x1xf32> -> vector<8x1xf32>
      %91 = vector.broadcast %90 : vector<8x1xf32> to vector<8x64xf32>
      %92 = arith.mulf %87, %91 : vector<8x64xf32>
      %93 = arith.truncf %92 : vector<8x64xf32> to vector<8x64xbf16>
      %c1_60 = arith.constant 1 : index
      %c0_61 = arith.constant 0 : index
      %c0_62 = arith.constant 0 : index
      %94 = vector.load %arg10[%c1_60, %c0_61, %c0_62] : memref<2x8x64xf32, #tpu.memory_space<vmem>>, vector<1x8x64xf32>
      %95 = vector.shape_cast %94 : vector<1x8x64xf32> to vector<8x64xf32>
      %c1_63 = arith.constant 1 : index
      %c0_64 = arith.constant 0 : index
      %c0_65 = arith.constant 0 : index
      %96 = vector.load %arg9[%c1_63, %c0_64, %c0_65] : memref<2x8x1xf32, #tpu.memory_space<vmem>>, vector<1x8x1xf32>
      %97 = vector.shape_cast %96 : vector<1x8x1xf32> to vector<8x1xf32>
      %98 = tpu.reciprocal %97 {approx = true} : vector<8x1xf32> -> vector<8x1xf32>
      %99 = vector.broadcast %98 : vector<8x1xf32> to vector<8x64xf32>
      %100 = arith.mulf %95, %99 : vector<8x64xf32>
      %101 = arith.truncf %100 : vector<8x64xf32> to vector<8x64xbf16>
      %102 = tpu.concatenate %93, %101 in 1 : vector<8x64xbf16>, vector<8x64xbf16> -> vector<8x128xbf16>
      %c0_66 = arith.constant 0 : index
      %c0_67 = arith.constant 0 : index
      %c0_68 = arith.constant 0 : index
      %103 = vector.load %arg7[%c0_66, %c0_67, %c0_68] : memref<1x8x128xbf16, #tpu.memory_space<vmem>>, vector<1x8x128xbf16>
      %104 = vector.shape_cast %103 : vector<1x8x128xbf16> to vector<8x128xbf16>
      %105 = vector.shape_cast %102 : vector<8x128xbf16> to vector<1x8x128xbf16>
      tpu.vector_store %arg7[%c0_66, %c0_67, %c0_68], %105 {strides = array<i32>} : memref<1x8x128xbf16, #tpu.memory_space<vmem>>, vector<1x8x128xbf16>,
    } else {
    }
    return
  }
  func.func @transform_0(%arg0: i32, %arg1: i32, %arg2: i32, %arg3: i32) -> (i32, i32, i32) {
    %c0_i32 = arith.constant 0 : i32
    return %arg0, %arg2, %arg1 : i32, i32, i32
  }
  func.func @transform_1(%arg0: i32, %arg1: i32, %arg2: i32, %arg3: i32) -> (i32, i32, i32) {
    %c4_i32 = arith.constant 4 : i32
    %0 = arith.addi %arg1, %c4_i32 : i32
    %c0_i32 = arith.constant 0 : i32
    return %arg0, %arg3, %0 : i32, i32, i32
  }
  func.func @transform_2(%arg0: i32, %arg1: i32, %arg2: i32, %arg3: i32) -> (i32, i32, i32) {
    %c8_i32 = arith.constant 8 : i32
    %0 = arith.addi %arg1, %c8_i32 : i32
    %c0_i32 = arith.constant 0 : i32
    return %arg0, %arg3, %0 : i32, i32, i32
  }
  func.func @transform_3(%arg0: i32, %arg1: i32, %arg2: i32, %arg3: i32) -> (i32, i32, i32) {
    %c0_i32 = arith.constant 0 : i32
    return %arg0, %arg2, %arg1 : i32, i32, i32
  }
}

module attributes {stable_mosaic.version = 11 : i64} {
  func.func @_matmul_bias_kernel(%arg0: i32, %arg1: i32, %arg2: i32, %arg3: memref<16x256xbf16, #tpu.memory_space<vmem>>, %arg4: memref<256x32xbf16, #tpu.memory_space<vmem>>, %arg5: memref<1x32xf32, #tpu.memory_space<vmem>>, %arg6: memref<16x32xf32, #tpu.memory_space<vmem>>, %arg7: memref<16x32xf32, #tpu.memory_space<vmem>>) attributes {dimension_semantics = [#tpu.dimension_semantics<parallel>, #tpu.dimension_semantics<parallel>, #tpu.dimension_semantics<arbitrary>], iteration_bounds = array<i64: 1, 1, 2>, scalar_prefetch = 0 : i64, scratch_operands = 1 : i64, tpu.core_type = #tpu.core_type<tc>, window_params = [{transform_indices = @transform_0, window_bounds = array<i64: 16, 256>}, {transform_indices = @transform_1, window_bounds = array<i64: 256, 32>}, {transform_indices = @transform_2, window_bounds = array<i64: 1, 32>}, {transform_indices = @transform_3, window_bounds = array<i64: 16, 32>}]} {
    %c0_i32 = arith.constant 0 : i32
    %0 = arith.cmpi eq, %arg2, %c0_i32 : i32
    %1 = arith.extui %0 : i1 to i32
    %c0_i32_0 = arith.constant 0 : i32
    %2 = arith.cmpi ne, %1, %c0_i32_0 : i32
    scf.if %2 {
      %cst_9 = arith.constant 0.000000e+00 : f32
      %12 = vector.broadcast %cst_9 : f32 to vector<16x32xf32>
      %c0_10 = arith.constant 0 : index
      %c0_11 = arith.constant 0 : index
      %13 = vector.load %arg7[%c0_10, %c0_11] : memref<16x32xf32, #tpu.memory_space<vmem>>, vector<16x32xf32>
      tpu.vector_store %arg7[%c0_10, %c0_11], %12 {strides = array<i32>} : memref<16x32xf32, #tpu.memory_space<vmem>>, vector<16x32xf32>,
    } else {
    }
    %c0 = arith.constant 0 : index
    %c0_1 = arith.constant 0 : index
    %3 = vector.load %arg7[%c0, %c0_1] : memref<16x32xf32, #tpu.memory_space<vmem>>, vector<16x32xf32>
    %c0_2 = arith.constant 0 : index
    %c0_3 = arith.constant 0 : index
    %4 = vector.load %arg3[%c0_2, %c0_3] : memref<16x256xbf16, #tpu.memory_space<vmem>>, vector<16x256xbf16>
    %c0_4 = arith.constant 0 : index
    %c0_5 = arith.constant 0 : index
    %5 = vector.load %arg4[%c0_4, %c0_5] : memref<256x32xbf16, #tpu.memory_space<vmem>>, vector<256x32xbf16>
    %cst = arith.constant dense<0.000000e+00> : vector<16x32xf32>
    %6 = tpu.matmul %4, %5, %cst {dimension_numbers = #tpu.dot_dimension_numbers<[1], [0], [0], [1], [0, 0, 1, 1], [], []>} : vector<16x256xbf16>, vector<256x32xbf16>, vector<16x32xf32> -> vector<16x32xf32>
    %7 = arith.addf %3, %6 : vector<16x32xf32>
    %c0_6 = arith.constant 0 : index
    %c0_7 = arith.constant 0 : index
    %8 = vector.load %arg7[%c0_6, %c0_7] : memref<16x32xf32, #tpu.memory_space<vmem>>, vector<16x32xf32>
    tpu.vector_store %arg7[%c0_6, %c0_7], %7 {strides = array<i32>} : memref<16x32xf32, #tpu.memory_space<vmem>>, vector<16x32xf32>,
    %c1_i32 = arith.constant 1 : i32
    %9 = arith.cmpi eq, %arg2, %c1_i32 : i32
    %10 = arith.extui %9 : i1 to i32
    %c0_i32_8 = arith.constant 0 : i32
    %11 = arith.cmpi ne, %10, %c0_i32_8 : i32
    scf.if %11 {
      %c0_9 = arith.constant 0 : index
      %c0_10 = arith.constant 0 : index
      %12 = vector.load %arg7[%c0_9, %c0_10] : memref<16x32xf32, #tpu.memory_space<vmem>>, vector<16x32xf32>
      %c0_11 = arith.constant 0 : index
      %c0_12 = arith.constant 0 : index
      %13 = vector.load %arg5[%c0_11, %c0_12] : memref<1x32xf32, #tpu.memory_space<vmem>>, vector<1x32xf32>
      %14 = vector.broadcast %13 : vector<1x32xf32> to vector<16x32xf32>
      %15 = arith.addf %12, %14 : vector<16x32xf32>
      %c0_13 = arith.constant 0 : index
      %c0_14 = arith.constant 0 : index
      %16 = vector.load %arg6[%c0_13, %c0_14] : memref<16x32xf32, #tpu.memory_space<vmem>>, vector<16x32xf32>
      tpu.vector_store %arg6[%c0_13, %c0_14], %15 {strides = array<i32>} : memref<16x32xf32, #tpu.memory_space<vmem>>, vector<16x32xf32>,
    } else {
    }
    return
  }
  func.func @transform_0(%arg0: i32, %arg1: i32, %arg2: i32) -> (i32, i32) {
    %c0_i32 = arith.constant 0 : i32
    return %arg0, %arg2 : i32, i32
  }
  func.func @transform_1(%arg0: i32, %arg1: i32, %arg2: i32) -> (i32, i32) {
    %c0_i32 = arith.constant 0 : i32
    return %arg2, %arg1 : i32, i32
  }
  func.func @transform_2(%arg0: i32, %arg1: i32, %arg2: i32) -> (i32, i32) {
    %c0_i32 = arith.constant 0 : i32
    %c0_i32_0 = arith.constant 0 : i32
    return %c0_i32, %arg1 : i32, i32
  }
  func.func @transform_3(%arg0: i32, %arg1: i32, %arg2: i32) -> (i32, i32) {
    %c0_i32 = arith.constant 0 : i32
    return %arg0, %arg1 : i32, i32
  }
}

</mosaic_0001>

<bundles_post_ra>
// kernel: attention_forward.3
= control target key start
LH: loop header
LB: loop body
LE: loop exit
PB: predicated region body
PF: predicated region fallthrough
CT: control target
= control target key end

     0   :  { %7 = vsyncpa [#allocation3], 0  ;;  %s845_s0 = inlined_call_operand.vmem [shape: bf16[16,32], index: 0, kind: input, shape index: {}]   ;;  %s846_s1 = inlined_call_operand.hbm [shape: bf16[32,1536], index: 1, kind: input, shape index: {}]   ;;  %s847_s2 = inlined_call_operand.vmem [shape: bf16[16,1536], index: 2, kind: output, shape index: {}]  }
   0x1   :  { %9 = vsyncpa [#allocation3 + $0x1], 0  ;;  %s706_s9 = smov 0   ;;  %s708_s10 = smov 0  }
   0x2   :  { %s710_s11 = smov 0   ;;  %s712_s12 = smov 0  }
   0x3   :  { %s714_s13 = smov 0   ;;  %s716_s14 = smov 0  }
   0x4 LB: > { %s495_s15 = sadd.s32 4294967295, %s684_s14   ;;  %s24_s16 = sadd.s32 1, %s680_s13  ;;  %s684_s14 = sphi %s716_s14, %s15_s14   ;;  %s680_s13 = sphi %s714_s13, %s858_s13   ;;  %s676_s12 = sphi %s712_s12, %s857_s12   ;;  %s672_s11 = sphi %s710_s11, %s856_s11   ;;  %s668_s10 = sphi %s708_s10, %s855_s10   ;;  %s664_s9 = sphi %s706_s9, %s854_s9  }
   0x5   : > { %p25_p0 = scmp.ge.s32.totalorder %s24_s16, 3  ;;  %s60_s17 = sadd.s32 1, %s672_s11 }
   0x6   : > { %p67_p1 = scmp.ne.s32.totalorder %s672_s11, %s668_s10  ;;  %p68_p2 = scmp.eq.s32.totalorder %s684_s14, 0 }
   0x7   : > { %s860_s16 = smov (%p25_p0, %s24_s16), 0  ;;  %p73_p4 = scmp.ne.s32.totalorder %s668_s10, %s664_s9 }
   0x8   : > { %p742_p3 = por %p68_p2, %p67_p1  ;;  %s57_s19 = ssub.s32 %s680_s13, %s860_s16 }
   0x9   : > { %p74_p5 = scmp.eq.s32.totalorder %s495_s15, 0  ;;  %p58_p6 = scmp.eq.s32.totalorder %s57_s19, 0 }
   0xa   : > { %p99_p7 = scmp.eq.s32.totalorder %s495_s15, 2  ;;  %p538_p10 = scmp.lt.s32.totalorder %s684_s14, 3 }
   0xb   : > { %p749_p8 = por %p74_p5, %p73_p4  ;;  %s134_s23 = sand.u32 1, %s672_s11  }
   0xc   : > { %s754_s21 = scalar_select %p58_p6, %s672_s11, %s60_s17  }
   0xd   : > { %p756_p9 = por %p99_p7, %p67_p1  ;;  %s526_s24 = sshll.u32 %s680_s13, 8 }
   0xe   : > { %s500_s25 = sshll.u32 %s134_s23, 6  ;;  %s766_s28 = scalar_lea.hbm %s846_s1, %s526_s24 }
   0xf   : > { %s850_s22 = scalar_select %p756_p9, 1, 0 }
  0x10   : > { %s138_s29 = scalar_lea.vmem [#allocation2], %s500_s25  ;;  %p770_p11 = pnand %p538_p10, %p742_p3 }
  0x11   : > { %s145_s30 = sshll.u32 %s138_s29, 4  ;;  %s777_s4 = scalar_lea.sflag [#allocation3], %s134_s23  ;;  %s774_s30 = int_to_ptr.vmem [resolvable:$true] %s145_s30 }
  0x12   : > { %s604_s5 = scalar_lea.hbm %s766_s28, 1024  ;;  %p606_p0 = pneg %p770_p11 }
  0x13   : > { %p605_p13 = scmp.ne.s32.totalorder %s766_s28, %s604_s5  ;;  %s609_s8 = scalar_lea.hbm %s846_s1, 3072 }
  0x14   : > { %p610_p3 = scmp.lt.u32.totalorder %s766_s28, %s846_s1  ;;  %p611_p4 = scmp.lt.u32.totalorder %s609_s8, %s604_s5 }
  0x15   : > { %p607_p1 = pnand %p606_p0, %p605_p13  ;;  %p613_p6 = scmp.lt.u32.totalorder %s604_s5, %s766_s28 }
  0x16   : > { %p612_p5 = por %p611_p4, %p610_p3 }
  0x17   : > { %p608_p2 = pneg %p607_p1 }
  0x18   : > { %p614_p7 = por %p613_p6, %p612_p5 }
  0x1a   : > { %p615_p10 = pnand %p614_p7, %p608_p2 }
  0x1c   : > { %618 = shalt.err (!%p615_p10)
}
  0x1d   : > { %s619_s17 = scalar_lea.vmem %s774_s30, 1024  ;;  %s686_s18 = smov [#allocation2]  }
  0x1e   : > { %p620_p13 = scmp.ne.s32.totalorder %s774_s30, %s619_s17  ;;  %s624_s19 = sshll.u32 %s686_s18, 4  ;;  %s625_s19 = int_to_ptr.vmem [resolvable:$false] %s624_s19 }
  0x1f   : > { %s626_s23 = scalar_lea.vmem %s625_s19, 2048  ;;  %p627_p9 = scmp.lt.s32.totalorder %s774_s30, %s625_s19 }
  0x20   : > { %p622_p1 = pnand %p620_p13, %p606_p0  ;;  %p628_p3 = scmp.lt.s32.totalorder %s626_s23, %s619_s17 }
  0x22   : > { %p623_p12 = pneg %p622_p1  ;;  %p629_p4 = por %p628_p3, %p627_p9 }
  0x24   : > { %p630_p5 = pnand %p629_p4, %p623_p12 }
  0x26   : > { %633 = shalt.err (!%p630_p5)
}
  0x27   : > { %s687_s24 = smov 768   ;;  %s688_s25 = smov 256  }
  0x28   : > { %s689_s26 = smov 16   ;;  %p153_p0 = scmp.lt.s32.totalorder %s684_s14, 4 }
  0x29   : > { %537 = dma.hbm_to_vmem [thread:$0]  (!%p770_p11), %s766_s28, 1024, %s774_s30, %s777_s4, %s687_s24, %s688_s25, %s689_s26  }
  0x2a   : > { %p852_p2 = scmp.ge.s32.totalorder %s684_s14, 1 }
  0x2c   : > { %p154_p6 = pnand %p852_p2, %p153_p0 }
  0x2d   : > { %s809_s27 = sand.u32 (!%p154_p6), 1, %s668_s10  }
  0x2e   : > { %157 = sbr.rel (%p154_p6) target bundleno = 290 (0x122), region = 28  ;;  %s504_s29 = sshll.u32 (!%p154_p6), %s809_s27, 6 }
  0x2f   : > { %s160_s5 = scalar_lea.sflag (!%p154_p6), [#allocation3], %s809_s27  ;;  %s163_s6 = scalar_lea.vmem (!%p154_p6), [#allocation2], %s504_s29 }
  0x35   : > { %659 = dma.done.wait (%p749_p8), %s160_s5, 1024  }
  0x36   : > { %661 = vsyncadd (%p749_p8), %s160_s5, 4294966272  ;;  %v690_v0 = vmov 0   ;;  %v591_v1 = vld [vmem:[%s163_s6 + $0x4] ss:$16 sps:$4 sm:$0xff]   ;;  %v593_v2 = vld [vmem:[%s163_s6 + $0xc] ss:$16 sps:$4 sm:$0xff]  }
  0x37   : > { %289 = vmatprep.mubr.bf16.mxu0 %v690_v0  ;;  %332 = vmatprep.mubr.bf16.mxu1 %v690_v0  ;;  %v595_v3 = vld [vmem:[%s163_s6] ss:$16 sps:$4 sm:$0xff]   ;;  %v596_v4 = vld [vmem:[%s163_s6 + $0x8] ss:$16 sps:$4 sm:$0xff]   ;;  %v597_v5 = vld [vmem:[%s163_s6 + $0x24] ss:$16 sps:$4 sm:$0xff]  }
  0x38   : > { %257 = vmatprep.subr.bf16.mxu0 %v591_v1  ;;  %300 = vmatprep.subr.bf16.mxu1 %v593_v2  ;;  %v599_v6 = vld [vmem:[%s163_s6 + $0x2c] ss:$16 sps:$4 sm:$0xff]   ;;  %v601_v7 = vld [vmem:[%s163_s6 + $0x20] ss:$16 sps:$4 sm:$0xff]   ;;  %v602_v8 = vld [vmem:[%s163_s6 + $0x28] ss:$16 sps:$4 sm:$0xff]  }
  0x39   : > { %258 = vmatpush1.bf16.msra.mxu0 %v595_v3  ;;  %301 = vmatpush1.bf16.msra.mxu1 %v596_v4  ;;  %v603_v9 = vld [vmem:[%s845_s0] sm:$0xff]   ;;  %vm253_vm0 = vcmask 261120   ;;  %s505_s30 = sshll.u32 %s809_s27, 5  ;;  %p853_p8 = scmp.ne.s32.totalorder %s850_s22, 0 }
  0x3a   : > { %259 = vmatprep.subr.bf16.mxu0 %v597_v5  ;;  %302 = vmatprep.subr.bf16.mxu1 %v599_v6  ;;  %s187_s3 = scalar_lea.vmem [#allocation4], %s505_s30  ;;  %s531_s4 = sshll.u32 (%p853_p8), %s676_s12, 4 }
  0x3b   : > { %s383_s9 = scalar_lea.vmem (%p853_p8), %s847_s2, %s531_s4 }
  0x3d   : > { %260 = vmatpush1.bf16.msra.mxu0 %v601_v7  ;;  %303 = vmatpush1.bf16.msra.mxu1 %v602_v8 }
  0x40   : > { %515 = vmatmul.mubr.msk.bf16.vlgmr.msra.gmra.mrb[0].mxu0 %vm253_vm0, %v603_v9  ;;  %516 = vmatmul.mubr.msk.bf16.vlgmr.msra.gmra.mrb[0].mxu1 %vm253_vm0, %v603_v9 }
 0x113   : > { %v291_v10 = vpop.f32.mrb[0].mxu0  ;;  %v334_v11 = vpop.f32.mrb[0].mxu1  ;;  %377 = sbr.rel (!%p853_p8) target bundleno = 290 (0x122), region = 36 }
 0x114   : > { %v293_v12 = vpop.f32.mrb[1].mxu0  ;;  %v336_v13 = vpop.f32.mrb[1].mxu1 }
 0x115   : > { %v527_v14 = vpack.c.bf16 %v293_v12, %v291_v10  ;;  %v528_v15 = vpack.c.bf16 %v336_v13, %v334_v11  ;;  %v295_v16 = vpop.f32.mrb[2].mxu0  ;;  %v338_v17 = vpop.f32.mrb[2].mxu1 }
 0x116   : > { %v297_v18 = vpop.f32.mrb[3].mxu0  ;;  %v340_v19 = vpop.f32.mrb[3].mxu1 }
 0x117   : > { %367 = vst [vmem:[%s187_s3] sm:$0xff] %v527_v14  ;;  %368 = vst [vmem:[%s187_s3 + $0x8] sm:$0xff] %v528_v15  ;;  %v529_v20 = vpack.c.bf16 %v297_v18, %v295_v16  ;;  %v530_v21 = vpack.c.bf16 %v340_v19, %v338_v17 }
 0x119   : > { %369 = vst [vmem:[%s187_s3 + $0x10] sm:$0xff] %v529_v20  ;;  %370 = vst [vmem:[%s187_s3 + $0x18] sm:$0xff] %v530_v21 }
 0x11e   : > { %v396_v22 = vld [vmem:[%s187_s3] sm:$0xff]  ;;  %v398_v23 = vld [vmem:[%s187_s3 + $0x8] sm:$0xff] }
 0x11f   : > { %397 = vst [vmem:[%s383_s9] sm:$0xff] %v396_v22  ;;  %399 = vst [vmem:[%s383_s9 + $0x8] sm:$0xff] %v398_v23 }
 0x120   : > { %v400_v24 = vld [vmem:[%s187_s3 + $0x10] sm:$0xff]  ;;  %v402_v25 = vld [vmem:[%s187_s3 + $0x18] sm:$0xff] }
 0x121   : > { %401 = vst [vmem:[%s383_s9 + $0x30] sm:$0xff] %v400_v24  ;;  %403 = vst [vmem:[%s383_s9 + $0x38] sm:$0xff] %v402_v25 }
 0x122 PF: > { %s15_s14 = sadd.s32 1, %s684_s14   ;;  %s854_s9 = smov %s668_s10 }
 0x123   : > { %p12_p9 = scmp.ge.s32.totalorder %s15_s14, 5   ;;  %s855_s10 = smov %s672_s11 }
 0x124   : > { %s856_s11 = smov %s754_s21  ;;  %s857_s12 = smov %s680_s13 }
 0x125   : > { %s858_s13 = smov %s860_s16  ;;  %14 = sbr.rel (!%p12_p9) target bundleno = 4 (0x4), region = 94 }
 0x12c   :  { %419 = vsyncpa [#allocation3], 1 }
 0x12d   :  { %421 = vsyncpa [#allocation3 + $0x1], 1 }

// kernel: attention_forward.4
= control target key start
LH: loop header
LB: loop body
LE: loop exit
PB: predicated region body
PF: predicated region fallthrough
CT: control target
= control target key end

     0   :  { %s1006_s12 = smov 0   ;;  %s1008_s13 = smov 0   ;;  %s1129_s0 = inlined_call_operand.vmem [shape: bf16[2,8,1536], index: 0, kind: input, shape index: {}, may-alias: {0,1,2}]   ;;  %s1130_s1 = inlined_call_operand.vmem [shape: bf16[2,8,1536], index: 1, kind: input, shape index: {}, may-alias: {0,1,2}]   ;;  %s1131_s2 = inlined_call_operand.vmem [shape: bf16[2,8,1536], index: 2, kind: input, shape index: {}, may-alias: {0,1,2}]   ;;  %s1132_s3 = inlined_call_operand.vmem [shape: bf16[2,8,512], index: 3, kind: output, shape index: {}]  }
   0x1   :  { %s1010_s14 = smov 0   ;;  %s1012_s15 = smov 0  }
   0x2   :  { %s1014_s16 = smov 0  }
   0x3 LB: > { %s35_s17 = sadd.s32 1, %s971_s14  ;;  %s39_s18 = sadd.s32 1, %s975_s15  ;;  %s979_s16 = sphi %s1014_s16, %s13_s16   ;;  %s975_s15 = sphi %s1012_s15, %s1136_s15   ;;  %s971_s14 = sphi %s1010_s14, %s1135_s14   ;;  %s967_s13 = sphi %s1008_s13, %s1134_s13   ;;  %s963_s12 = sphi %s1006_s12, %s1133_s12  }
   0x4   : > { %p37_p0 = scmp.ge.s32.totalorder %s35_s17, 4  ;;  %p833_p1 = scmp.ge.s32.totalorder %s979_s16, 1 }
   0x5   : > { %p228_p2 = scmp.lt.s32.totalorder %s979_s16, 9 }
   0x6   : > { %s1138_s17 = smov (%p37_p0, %s35_s17), 0  ;;  %s1140_s18 = smov (!%p37_p0, %s39_s18), %s975_s15 }
   0x7   : > { %p229_p3 = pnand %p833_p1, %p228_p2  ;;  %p41_p4 = scmp.ge.s32.totalorder %s1140_s18, 2 }
   0x8   : > { %p292_p5 = scmp.lt.s32.totalorder (!%p229_p3), %s967_s13, 1  ;;  %s304_s19 = sadd.s32 (!%p229_p3), 4, %s963_s12  ;;  %vm355_vm0 = vcmask (!%p229_p3), 523264   ;;  %v981_v0 = vmov (!%p229_p3), 0.0   ;;  %vm982_vm1 = vmmov (!%p229_p3), 0   ;;  %vm350_vm2 = vcmask (!%p229_p3), 7168  }
   0x9   : > { %s1142_s18 = smov (%p41_p4, %s1140_s18), 0  ;;  %232 = sbr.rel (%p229_p3) target bundleno = 1454 (0x5ae), region = 32 }
   0xa   : > { %856 = vmatprep.subr.bf16.mxu0 (!%p229_p3), %v981_v0  ;;  %p309_p6 = scmp.lt.s32.totalorder (!%p229_p3), %s304_s19, 11  ;;  %356 = vst.msk [vmem:[#allocation4] sm:$0xff] (!%p229_p3), %vm355_vm0, %v981_v0  ;;  %357 = vst.msk [vmem:[#allocation4 + $0x8] sm:$0xff] (!%p229_p3), %vm355_vm0, %v981_v0  ;;  %858 = vmatprep.mubr.msk.bf16.mxu0 (!%p229_p3), %vm982_vm1, %v981_v0  ;;  %p296_p7 = scmp.lt.s32.totalorder (!%p229_p3), %s963_s12, 11  ;;  %v983_v5 = vmov (!%p229_p3), -inf   ;;  %vm410_vm3 = vcmask (!%p229_p3), 64512  }
   0xb   : > { %862 = vmatprep.subr.bf16.mxu1 (!%p229_p3), %v981_v0  ;;  %864 = vmatprep.mubr.msk.bf16.mxu1 (!%p229_p3), %vm982_vm1, %v981_v0  ;;  %351 = vst.msk [vmem:[#allocation2] sm:$0xff] (!%p229_p3), %vm350_vm2, %v983_v5  ;;  %352 = vst.msk [vmem:[#allocation2 + $0x8] sm:$0xff] (!%p229_p3), %vm350_vm2, %v983_v5  ;;  %v984_v11 = vmov (!%p229_p3), 0   ;;  %s985_s5 = smov (!%p229_p3), 64   ;;  %s318_s6 = sadd.s32 (!%p229_p3), 8, %s963_s12  ;;  %vm445_vm4 = vcmask (!%p229_p3), 1043456  }
   0xc   : > { %353 = vst.msk [vmem:[#allocation3] sm:$0xff] (!%p229_p3), %vm350_vm2, %v981_v0  ;;  %354 = vst.msk [vmem:[#allocation3 + $0x8] sm:$0xff] (!%p229_p3), %vm350_vm2, %v981_v0  ;;  %926 = vset.pattern.permute.xlu0 (!%p229_p3), %v984_v11  ;;  %927 = vset.pattern.permute.xlu1 (!%p229_p3), %v984_v11  ;;  %p323_p8 = scmp.lt.s32.totalorder (!%p229_p3), %s318_s6, 11  ;;  %p336_p9 = scmp.lt.s32.totalorder (!%p229_p3), %s963_s12, 3 }
  0x10   : > { %s1144_s13 = smov (!%p292_p5, %s967_s13), 1  ;;  %s1146_s19 = smov (!%p309_p6, %s304_s19), 11 }
  0x11   : > { %s1053_s20 = smul.u32 12, %s1144_s13  ;;  %s1148_s6 = smov (!%p323_p8, %s318_s6), 11 }
  0x12   : > { %s297_s21 = scalar_select %p296_p7, %s963_s12, 11  ;;  %v1078_v14 = vld [vmem:[#allocation2] sm:$0xff]  ;;  %v549_v38 = vld [vmem:[#allocation2 + $0x8] sm:$0xff] }
  0x13   : > { %s314_s22 = sadd.s32 %s1053_s20, %s1146_s19  ;;  %s328_s7 = sadd.s32 %s1053_s20, %s1148_s6  ;;  %v426_v55 = vld [vmem:[#allocation3] sm:$0xff]  ;;  %v566_v61 = vld [vmem:[#allocation3 + $0x8] sm:$0xff] }
  0x14   : > { %s835_s23 = sshll.u32 %s314_s22, 2  ;;  %s301_s24 = sadd.s32 %s1053_s20, %s297_s21 }
  0x15   : > { %s316_s27 = scalar_lea.vmem %s1130_s1, %s835_s23  ;;  %s834_s28 = sshll.u32 %s301_s24, 2 }
  0x16   : > { %v360_v1 = vld [vmem:[%s316_s27] sm:$0xf]  ;;  %s303_s4 = scalar_lea.vmem %s1129_s0, %s834_s28  ;;  %s836_s8 = sshll.u32 %s328_s7, 2 }
  0x17   : > { %v367_v2 = vsel %vm355_vm0, %v360_v1, 0  ;;  %v358_v3 = vld [vmem:[%s303_s4] sm:$0xf]  ;;  %v842_v12 = vcombine.low %v360_v1, %v360_v1  ;;  %s330_s11 = scalar_lea.vmem %s1131_s2, %s836_s8  ;;  %s1150_s12 = smov (!%p336_p9, %s963_s12), 3 }
  0x18   : > { %857 = vmatpush3.bf16.xpose.msra.mxu0 %v367_v2  ;;  %v359_v4 = vmul.bf16 1040203264, %v358_v3  ;;  %v361_v18 = vld [vmem:[%s330_s11] sm:$0xf]  ;;  %s837_s19 = sshll.u32 %s1144_s13, 2 }
  0x19   : > { %874 = vmatprep.subr.bf16.mxu0 %v981_v0  ;;  %500 = vrot.lane.b32.xlu1 %v842_v12, %s985_s5  ;;  %v447_v19 = vsel %vm445_vm4, %v361_v18, 0  ;;  %v844_v20 = vcombine.low %v361_v18, %v361_v18  ;;  %v434_v2 = vld [vmem:[#allocation4] sm:$0xff]  ;;  %s341_s20 = sadd.s32 %s837_s19, %s1150_s12 }
  0x1a   : > { %v841_v13 = vcombine.low %v359_v4, %v359_v4  ;;  %863 = vmatpush3.bf16.msra.mxu1 %v447_v19  ;;  %s838_s21 = sshll.u32 %s341_s20, 2 }
  0x1b   : > { %868 = vmatprep.subr.bf16.mxu1 %v981_v0  ;;  %s343_s24 = scalar_lea.vmem %s1132_s3, %s838_s21 }
  0x1d   : > { %495 = vrot.lane.b32.xlu1 %v841_v13, %s985_s5 }
  0x1f   : > { %859 = vmatmul.mubr.msk.bf16.vlgmr.msra.gmra.mrb[0].mxu0 %vm355_vm0, %v359_v4 }
  0x20   : > { %876 = vmatprep.mubr.msk.bf16.mxu0 %vm982_vm1, %v981_v0 }
  0x8b   : > { %v501_v24 = vpop.permute.xlu1 %500 }
  0x8c   : > { %v506_v26 = vsel %vm355_vm0, %v501_v24, 0 }
  0x8f   : > { %v496_v28 = vpop.permute.xlu1 %495 }
  0xf2   : > { %v403_v6 = vpop.f32.mrb[0].mxu0 }
  0xf3   : > { %v860_v7 = vpop.f32.mrb[1].mxu0  ;;  %v411_v8 = vsel %vm410_vm3, %v403_v6, -inf }
  0xf4   : > { %412 = vmax.xlane.f32.xlu0 %v411_v8  ;;  %v406_v9 = vpop.f32.mrb[2].mxu0  ;;  %v574_v8 = vld [vmem:[#allocation4 + $0x8] sm:$0xff] }
  0xf5   : > { %v861_v10 = vpop.f32.mrb[3].mxu0 }
 0x181   : > { %v413_v15 = vpop.xlane.xlu0 %412 }
 0x182   : > { %v414_v16 = vmax.f32 %v1078_v14, %v413_v15 }
 0x184   : > { %v415_v17 = vsub.f32 %v1078_v14, %v414_v16  ;;  %491 = vst.msk [vmem:[#allocation2] sm:$0xff] %vm350_vm2, %v414_v16  ;;  %420 = vperm.xlu0 %926, %v414_v16  }
 0x186   : > { %v416_v52 = vmul.f32 1.442695, %v415_v17 }
 0x188   : > { %585 = vrot.lane.b32.xlu0 %v844_v20, %s985_s5 }
 0x203   : > { %v421_v21 = vpop.permute.xlu0 %420 }
 0x204   : > { %v423_v22 = vsub.f32 %v403_v6, %v421_v21 }
 0x206   : > { %v424_v23 = vmul.f32 1.442695, %v423_v22 }
 0x207   : > { %v586_v42 = vpop.permute.xlu0 %585 }
 0x208   : > { %929 = vpow2.f32 %v424_v23  ;;  %v591_v43 = vsel %vm445_vm4, %v586_v42, 0 }
 0x209   : > { %875 = vmatpush3.bf16.msra.mxu0 %v591_v43 }
 0x212   : > { %v930_v25 = vpop.eup %929 }
 0x213   : > { %v441_v27 = vpack.c.bf16 %v930_v25, %v930_v25  ;;  %v428_v44 = vsel %vm410_vm3, %v930_v25, 0.0 }
 0x215   : > { %865 = vmatmul.mubr.msk.bf16.vlgmr.msra.gmra.mrb[0].mxu1 %vm410_vm3, %v441_v27 }
 0x216   : > { %869 = vmatpush3.bf16.xpose.msra.mxu1 %v506_v26  ;;  %870 = vmatprep.mubr.msk.bf16.mxu1 %vm982_vm1, %v981_v0 }
 0x21d   : > { %871 = vmatmul.mubr.msk.bf16.vlgmr.msra.gmra.mrb[4].mxu1 %vm355_vm0, %v496_v28 }
 0x2e8   : > { %v483_v29 = vpop.f32.mrb[0].mxu1 }
 0x2e9   : > { %v866_v30 = vpop.f32.mrb[1].mxu1 }
 0x2ea   : > { %v486_v31 = vpop.f32.mrb[2].mxu1 }
 0x2eb   : > { %v867_v32 = vpop.f32.mrb[3].mxu1 }
 0x2f0   : > { %v542_v33 = vpop.f32.mrb[4].mxu1 }
 0x2f1   : > { %v872_v34 = vpop.f32.mrb[5].mxu1  ;;  %v550_v35 = vsel %vm410_vm3, %v542_v33, -inf }
 0x2f2   : > { %551 = vmax.xlane.f32.xlu1 %v550_v35  ;;  %v545_v36 = vpop.f32.mrb[6].mxu1 }
 0x2f3   : > { %v873_v37 = vpop.f32.mrb[7].mxu1 }
 0x37f   : > { %v552_v39 = vpop.xlane.xlu1 %551 }
 0x380   : > { %v553_v40 = vmax.f32 %v549_v38, %v552_v39 }
 0x382   : > { %v554_v41 = vsub.f32 %v549_v38, %v553_v40  ;;  %635 = vst.msk [vmem:[#allocation2 + $0x8] sm:$0xff] %vm350_vm2, %v553_v40  ;;  %559 = vperm.xlu1 %927, %v553_v40  }
 0x384   : > { %v555_v51 = vmul.f32 1.442695, %v554_v41 }
 0x3a6   : > { %429 = vadd.xlane.f32.xlu1 %v428_v44 }
 0x401   : > { %v560_v45 = vpop.permute.xlu1 %559 }
 0x402   : > { %v562_v46 = vsub.f32 %v542_v33, %v560_v45 }
 0x404   : > { %v563_v47 = vmul.f32 1.442695, %v562_v46 }
 0x406   : > { %931 = vpow2.f32 %v563_v47 }
 0x407   : > { %933 = vpow2.f32 %v555_v51 }
 0x408   : > { %935 = vpow2.f32 %v416_v52 }
 0x410   : > { %v932_v48 = vpop.eup %931 }
 0x411   : > { %v568_v49 = vsel %vm410_vm3, %v932_v48, 0.0  ;;  %v581_v50 = vpack.c.bf16 %v932_v48, %v932_v48  ;;  %v934_v53 = vpop.eup %933 }
 0x412   : > { %569 = vadd.xlane.f32.xlu0 %v568_v49  ;;  %v936_v54 = vpop.eup %935  ;;  %v567_v62 = vmul.f32 %v934_v53, %v566_v61 }
 0x413   : > { %877 = vmatmul.mubr.msk.bf16.vlgmr.msra.gmra.mrb[4].mxu0 %vm410_vm3, %v581_v50  ;;  %v427_v56 = vmul.f32 %v936_v54, %v426_v55 }
 0x428   : > { %577 = vperm.xlu0 %926, %v934_v53  }
 0x42c   : > { %437 = vperm.xlu0 %926, %v936_v54  }
 0x433   : > { %v430_v57 = vpop.xlane.xlu1 %429 }
 0x434   : > { %v431_v58 = vadd.f32 %v430_v57, %v427_v56 }
 0x436   : > { %433 = vst.msk [vmem:[#allocation3] sm:$0xff] %vm350_vm2, %v431_v58 }
 0x43d   : > { %v640_v59 = vld [vmem:[#allocation3] sm:$0xff] }
 0x43e   : > { %937 = vrcp.f32 %v640_v59 }
 0x448   : > { %v938_v60 = vpop.eup %937 }
 0x449   : > { %644 = vperm.xlu0 %926, %v938_v60  }
 0x49f   : > { %v570_v63 = vpop.xlane.xlu0 %569 }
 0x4a0   : > { %v571_v0 = vadd.f32 %v570_v63, %v567_v62 }
 0x4a2   : > { %572 = vst.msk [vmem:[#allocation3 + $0x8] sm:$0xff] %vm350_vm2, %v571_v0 }
 0x4a7   : > { %v578_v1 = vpop.permute.xlu0 %577 }
 0x4a8   : > { %v580_v9 = vmul.f32 %v578_v1, %v574_v8 }
 0x4a9   : > { %v650_v3 = vld [vmem:[#allocation3 + $0x8] sm:$0xff] }
 0x4aa   : > { %939 = vrcp.f32 %v650_v3 }
 0x4ab   : > { %v438_v4 = vpop.permute.xlu0 %437 }
 0x4ac   : > { %v440_v5 = vmul.f32 %v438_v4, %v434_v2 }
 0x4ae   : > { %v489_v6 = vadd.f32 %v483_v29, %v440_v5 }
 0x4b0   : > { %490 = vst.msk [vmem:[#allocation4] sm:$0xff] %vm355_vm0, %v489_v6 }
 0x4b4   : > { %v940_v7 = vpop.eup %939 }
 0x4b5   : > { %654 = vperm.xlu1 %927, %v940_v7  }
 0x4b7   : > { %v639_v20 = vld [vmem:[#allocation4] sm:$0xff] }
 0x4c8   : > { %v645_v19 = vpop.permute.xlu0 %644 }
 0x4c9   : > { %v647_v21 = vmul.f32 %v645_v19, %v639_v20 }
 0x4cb   : > { %v648_v22 = vpack.c.bf16 %v647_v21, %v647_v21 }
 0x4e6   : > { %v627_v10 = vpop.f32.mrb[4].mxu0 }
 0x4e7   : > { %v633_v11 = vadd.f32 %v627_v10, %v580_v9  ;;  %v878_v12 = vpop.f32.mrb[5].mxu0 }
 0x4e8   : > { %v630_v13 = vpop.f32.mrb[6].mxu0 }
 0x4e9   : > { %634 = vst.msk [vmem:[#allocation4 + $0x8] sm:$0xff] %vm355_vm0, %v633_v11  ;;  %v879_v14 = vpop.f32.mrb[7].mxu0 }
 0x4f0   : > { %v649_v16 = vld [vmem:[#allocation4 + $0x8] sm:$0xff] }
 0x534   : > { %v655_v15 = vpop.permute.xlu1 %654 }
 0x535   : > { %v657_v17 = vmul.f32 %v655_v15, %v649_v16 }
 0x537   : > { %v658_v18 = vpack.c.bf16 %v657_v17, %v657_v17 }
 0x539   : > { %660 = vrot.lane.b32.xlu0 %v658_v18, %s985_s5 }
 0x5ab   : > { %v661_v23 = vpop.permute.xlu0 %660 }
 0x5ac   : > { %v664_v24 = vsel %vm355_vm0, %v648_v22, %v661_v23 }
 0x5ad   : > { %666 = vst [vmem:[%s343_s24] sm:$0xf] %v664_v24 }
 0x5ae PF: > { %s13_s16 = sadd.s32 1, %s979_s16   ;;  %s1133_s12 = smov %s971_s14 }
 0x5af   : > { %p10_p10 = scmp.ge.s32.totalorder %s13_s16, 10   ;;  %s1134_s13 = smov %s975_s15 }
 0x5b0   : > { %s1135_s14 = smov %s1138_s17  ;;  %s1136_s15 = smov %s1142_s18 }
 0x5b1   :  { %12 = sbr.rel (!%p10_p10) target bundleno = 3 (0x3), region = 79 }

// kernel: attention_forward.5
= control target key start
LH: loop header
LB: loop body
LE: loop exit
PB: predicated region body
PF: predicated region fallthrough
CT: control target
= control target key end

     0   :  { %8 = vsyncpa [#allocation5], 0  ;;  %s816_s12 = smov 0   ;;  %s818_s13 = smov 0   ;;  %s944_s0 = inlined_call_operand.vmem [shape: bf16[16,512], index: 0, kind: input, shape index: {}]   ;;  %s945_s1 = inlined_call_operand.vmem [shape: bf16[512,32], index: 1, kind: input, shape index: {}]   ;;  %s946_s2 = inlined_call_operand.vmem [shape: f32[1,32], index: 2, kind: input, shape index: {}]   ;;  %s947_s3 = inlined_call_operand.hbm [shape: f32[16,32], index: 3, kind: output, shape index: {}]  }
   0x1   :  { %s820_s14 = smov 0   ;;  %s822_s15 = smov 0  }
   0x2   :  { %s824_s16 = smov 0  }
   0x3 LB: > { %s594_s17 = sadd.s32 4294967295, %s790_s16   ;;  %s26_s18 = sadd.s32 1, %s786_s15  ;;  %s790_s16 = sphi %s824_s16, %s14_s16   ;;  %s786_s15 = sphi %s822_s15, %s952_s15   ;;  %s782_s14 = sphi %s820_s14, %s951_s14   ;;  %s778_s13 = sphi %s818_s13, %s950_s13   ;;  %s774_s12 = sphi %s816_s12, %s949_s12  }
   0x4   : > { %p27_p0 = scmp.ge.s32.totalorder %s26_s18, 2  ;;  %p49_p1 = scmp.ne.s32.totalorder %s778_s13, %s774_s12 }
   0x5   : > { %p50_p2 = scmp.eq.s32.totalorder %s790_s16, 0  ;;  %s42_s20 = sadd.s32 1, %s778_s13 }
   0x6   : > { %s954_s18 = smov (%p27_p0, %s26_s18), 0  ;;  %p597_p5 = scmp.ge.s32.totalorder %s790_s16, 2 }
   0x7   : > { %p51_p3 = por %p50_p2, %p49_p1  ;;  %s38_s19 = ssub.s32 %s786_s15, %s954_s18 }
   0x8   : > { %p40_p4 = scmp.eq.s32.totalorder %s38_s19, 0  ;;  %163 = sbr.rel (%p597_p5) target bundleno = 22 (0x16), region = 20 }
   0xa   : > { %s852_s21 = scalar_select %p40_p4, %s778_s13, %s42_s20  }
   0xf   : > { %166 = sbr.rel (!%p51_p3) target bundleno = 22 (0x16), region = 24  ;;  %s168_s22 = sand.u32 (%p51_p3), 1, %s778_s13  }
  0x10   : > { %s630_s23 = sshll.u32 (%p51_p3), %s786_s15, 3  ;;  %s598_s24 = sshll.u32 (%p51_p3), %s168_s22, 4 }
  0x11   : > { %s176_s27 = scalar_lea.vmem (%p51_p3), %s944_s0, %s630_s23  ;;  %s170_s28 = scalar_lea.vmem (%p51_p3), [#allocation3], %s598_s24 }
  0x12   : > { %v206_v0 = vld [vmem:[%s176_s27] sm:$0xff] (%p51_p3)  ;;  %v208_v1 = vld [vmem:[%s176_s27 + $0x10] sm:$0xff] (%p51_p3) }
  0x13   : > { %207 = vst [vmem:[%s170_s28] sm:$0xff] (%p51_p3), %v206_v0  ;;  %209 = vst [vmem:[%s170_s28 + $0x8] sm:$0xff] (%p51_p3), %v208_v1 }
  0x16 PF: > { %p601_p6 = scmp.ge.s32.totalorder %s790_s16, 1  ;;  %p226_p7 = scmp.lt.s32.totalorder %s790_s16, 3 }
  0x18   : > { %p227_p8 = pnand %p601_p6, %p226_p7 }
  0x19   : > { %s233_s29 = sand.u32 (!%p227_p8), 1, %s774_s12   ;;  %s603_s30 = sshll.u32 (!%p227_p8), %s782_s14, 5 }
  0x1a   : > { %230 = sbr.rel (%p227_p8) target bundleno = 329 (0x149), region = 66  ;;  %s864_s4 = sshll.u32 (!%p227_p8), %s233_s29, 4 }
  0x1b   : > { %p265_p9 = scmp.lt.s32.totalorder (!%p227_p8), %s603_s30, 63  ;;  %s235_s9 = scalar_lea.vmem (!%p227_p8), [#allocation3], %s864_s4 }
  0x1c   : > { %p605_p10 = scmp.ne.s32.totalorder (!%p227_p8), %s782_s14, 0 }
  0x21   : > { %s956_s30 = smov (!%p265_p9, %s603_s30), 63  ;;  %281 = sbr.rel (%p605_p10) target bundleno = 40 (0x28), region = 74 }
  0x22   : > { %s604_s5 = sshll.u32 %s956_s30, 2  ;;  %vm282_vm0 = vcmask (!%p605_p10), 261120   ;;  %v792_v2 = vmov (!%p605_p10), 0.0  }
  0x23   : > { %s869_s8 = scalar_lea.vmem %s945_s1, %s604_s5  ;;  %283 = vst.msk [vmem:[#allocation2] sm:$0xff] (!%p605_p10), %vm282_vm0, %v792_v2  ;;  %284 = vst.msk [vmem:[#allocation2 + $0x8] sm:$0xff] (!%p605_p10), %vm282_vm0, %v792_v2 }
  0x28 PF: > { %v703_v3 = vld [vmem:[%s869_s8 + $0x40] sm:$0xff]   ;;  %v705_v5 = vld [vmem:[%s869_s8 + $0x48] sm:$0xff]   ;;  %v707_v7 = vld [vmem:[%s869_s8 + $0x50] sm:$0xff]   ;;  %vm470_vm1 = vcmask 261120   ;;  %p624_p11 = scmp.ne.s32.totalorder %s782_s14, 1 }
  0x29   : > { %v704_v4 = vld [vmem:[%s869_s8] sm:$0xff]   ;;  %631 = vmatprep.subr.bf16.mxu0 %v703_v3  ;;  %v706_v6 = vld [vmem:[%s869_s8 + $0x8] sm:$0xff]   ;;  %v708_v8 = vld [vmem:[%s869_s8 + $0x10] sm:$0xff]  }
  0x2a   : > { %632 = vmatpush3.bf16.msra.mxu0 %v704_v4  ;;  %v709_v9 = vld [vmem:[%s869_s8 + $0x58] sm:$0xff]   ;;  %v711_v11 = vld [vmem:[%s869_s8 + $0x60] sm:$0xff]   ;;  %v713_v13 = vld [vmem:[%s869_s8 + $0x68] sm:$0xff]  }
  0x2b   : > { %633 = vmatprep.subr.bf16.mxu0 %v705_v5  ;;  %v710_v10 = vld [vmem:[%s869_s8 + $0x18] sm:$0xff]   ;;  %v712_v12 = vld [vmem:[%s869_s8 + $0x20] sm:$0xff]   ;;  %v714_v15 = vld [vmem:[%s869_s8 + $0x28] sm:$0xff]  }
  0x2c   : > { %v721_v14 = vld [vmem:[%s235_s9 + $0x4] ss:$8 sps:$4 sm:$0xff]   ;;  %v719_v20 = vld [vmem:[%s235_s9] ss:$8 sps:$4 sm:$0xff]  }
  0x2d   : > { %459 = vmatprep.mubr.bf16.mxu0 %v721_v14  ;;  %v715_v16 = vld [vmem:[%s869_s8 + $0x70] sm:$0xff]   ;;  %v717_v18 = vld [vmem:[%s869_s8 + $0x78] sm:$0xff]   ;;  %v285_v22 = vld [vmem:[#allocation2] sm:$0xff] }
  0x2e   : > { %634 = vmatpush3.bf16.msra.mxu0 %v706_v6  ;;  %v716_v17 = vld [vmem:[%s869_s8 + $0x30] sm:$0xff]   ;;  %v718_v19 = vld [vmem:[%s869_s8 + $0x38] sm:$0xff]   ;;  %v286_v26 = vld [vmem:[#allocation2 + $0x8] sm:$0xff] }
  0x2f   : > { %635 = vmatprep.subr.bf16.mxu0 %v707_v7  ;;  %v625_v32 = vld [vmem:[%s946_s2] ss:$0 sm:$0xff] (!%p624_p11) }
  0x32   : > { %636 = vmatpush3.bf16.msra.mxu0 %v708_v8 }
  0x33   : > { %637 = vmatprep.subr.bf16.mxu0 %v709_v9 }
  0x36   : > { %638 = vmatpush3.bf16.msra.mxu0 %v710_v10 }
  0x37   : > { %639 = vmatprep.subr.bf16.mxu0 %v711_v11 }
  0x3a   : > { %640 = vmatpush3.bf16.msra.mxu0 %v712_v12 }
  0x3b   : > { %641 = vmatprep.subr.bf16.mxu0 %v713_v13 }
  0x3e   : > { %642 = vmatpush3.bf16.msra.mxu0 %v714_v15 }
  0x3f   : > { %643 = vmatprep.subr.bf16.mxu0 %v715_v16 }
  0x42   : > { %644 = vmatpush3.bf16.msra.mxu0 %v716_v17 }
  0x43   : > { %645 = vmatprep.subr.bf16.mxu0 %v717_v18 }
  0x46   : > { %646 = vmatpush3.bf16.msra.mxu0 %v718_v19 }
  0x49   : > { %460 = vmatmul.mubr.bf16.vlgmr.msra.gmra.mrb[0].mxu0 %v719_v20 }
 0x11c   : > { %v647_v21 = vpop.f32.mrb[0].mxu0 }
 0x11d   : > { %v648_v23 = vpop.f32.mrb[1].mxu0 }
 0x11e   : > { %v649_v24 = vadd.f32 %v648_v23, %v647_v21  ;;  %v650_v25 = vpop.f32.mrb[2].mxu0  ;;  %476 = sbr.rel (%p624_p11) target bundleno = 303 (0x12f), region = 78 }
 0x11f   : > { %v651_v27 = vpop.f32.mrb[3].mxu0 }
 0x120   : > { %v468_v28 = vadd.f32 %v649_v24, %v285_v22  ;;  %v652_v29 = vadd.f32 %v651_v27, %v650_v25 }
 0x122   : > { %471 = vst.msk [vmem:[#allocation2] sm:$0xff] %vm470_vm1, %v468_v28  ;;  %v469_v30 = vadd.f32 %v652_v29, %v286_v26 }
 0x124   : > { %472 = vst.msk [vmem:[#allocation2 + $0x8] sm:$0xff] %vm470_vm1, %v469_v30 }
 0x129   : > { %v477_v31 = vld [vmem:[#allocation2] sm:$0xff] }
 0x12a   : > { %v486_v34 = vadd.f32 %v625_v32, %v477_v31 }
 0x12b   : > { %v478_v33 = vld [vmem:[#allocation2 + $0x8] sm:$0xff] }
 0x12c   : > { %v487_v35 = vadd.f32 %v625_v32, %v478_v33  ;;  %488 = vst.msk [vmem:[#allocation4] sm:$0xff] %vm470_vm1, %v486_v34 }
 0x12e   : > { %489 = vst.msk [vmem:[#allocation4 + $0x8] sm:$0xff] %vm470_vm1, %v487_v35 }
 0x12f PF: > { %p903_p12 = scmp.eq.s32.totalorder %s594_s17, 1  ;;  %s793_s14 = smov [#allocation4]  }
 0x130   : > { %s500_s19 = sshll.u32 %s793_s14, 4  ;;  %s501_s19 = int_to_ptr.vmem [resolvable:$true] %s500_s19 }
 0x131   : > { %s722_s20 = scalar_lea.vmem %s501_s19, 256  ;;  %p729_p2 = scmp.lt.s32.totalorder %s501_s19, %s501_s19 }
 0x132   : > { %p723_p13 = scmp.ne.s32.totalorder %s501_s19, %s722_s20  ;;  %p730_p3 = scmp.lt.s32.totalorder %s722_s20, %s722_s20 }
 0x134   : > { %p724_p0 = pnand %p723_p13, %p903_p12  ;;  %p731_p4 = por %p730_p3, %p729_p2 }
 0x136   : > { %p725_p1 = pneg %p724_p0 }
 0x138   : > { %p732_p5 = pnand %p731_p4, %p725_p1 }
 0x13a   : > { %735 = shalt.err (!%p732_p5)
}
 0x13b   : > { %s736_s17 = scalar_lea.hbm %s947_s3, 256 }
 0x13c   : > { %p737_p6 = scmp.ne.s32.totalorder %s947_s3, %s736_s17  ;;  %p742_p9 = scmp.lt.u32.totalorder %s736_s17, %s947_s3 }
 0x13e   : > { %p738_p7 = pnand %p737_p6, %p903_p12 }
 0x140   : > { %p739_p8 = pneg %p738_p7 }
 0x142   : > { %p744_p10 = pnand %p742_p9, %p739_p8 }
 0x144   : > { %747 = shalt.err (!%p744_p10)
}
 0x145   : > { %s794_s28 = smov 128   ;;  %s795_s29 = smov 8  }
 0x146   : > { %654 = dma.vmem_to_hbm [thread:$0]  (%p903_p12), %s501_s19, 256, %s947_s3, [#allocation5], %s794_s28, %s794_s28, %s795_s29  }
 0x147   : > { %769 = dma.done.wait (%p903_p12), [#allocation5], 256  }
 0x148   : > { %771 = vsyncadd (%p903_p12), [#allocation5], 4294967040 }
 0x149 PF: > { %s14_s16 = sadd.s32 1, %s790_s16   ;;  %s949_s12 = smov %s778_s13 }
 0x14a   : > { %p11_p11 = scmp.ge.s32.totalorder %s14_s16, 4   ;;  %s950_s13 = smov %s852_s21 }
 0x14b   : > { %s951_s14 = smov %s786_s15  ;;  %s952_s15 = smov %s954_s18 }
 0x14c   :  { %13 = sbr.rel (!%p11_p11) target bundleno = 3 (0x3), region = 117 }
 0x153   :  { %516 = vsyncpa [#allocation5], 1 }
 0x154   :  { %518 = vsyncpa [#allocation5 + $0x1], 1 }

</bundles_post_ra>
